<compile_context>
chip_gen: v7x
topology: tpu7x:2x2x1
jax: 0.10.0
libtpu: 0.0.40
codegen_flags: <defaults>
</compile_context>

<pallas_src>
import functools

import jax
import jax.numpy as jnp
from jax.experimental import pallas as pl
from jax.experimental.pallas import tpu as pltpu

_LANE = 128
_SUBLANE = 8
# Up to (16384, 128) f32 per input per grid step = 8 MiB; 2 inputs x 2
# pipeline buffers = 32 MiB (fits v7x's 64 MiB physical VMEM with headroom).
_MAX_BLOCK_ROWS = 16384
# In-kernel streaming chunk (rows) -> bounds VMEM temporaries to ~256 KiB.
_CHUNK_ROWS = 512
# Explicit scoped-VMEM budget covering the double-buffered working set.
_VMEM_LIMIT_BYTES = 48 * 1024 * 1024


def _round_up(x, m):
    return ((x + m - 1) // m) * m


def _is_multi_tensorcore_chip():
    """True on chips with >1 TensorCore per device (v7x); False on v5e/v6e."""
    try:
        kind = jax.devices()[0].device_kind.lower()
    except Exception:  # pragma: no cover - defensive
        return False
    return ("v7" in kind) or ("7x" in kind)


def _mse_partial_kernel(p_ref, t_ref, o_ref, *, rows, block_rows, chunk,
                        steps_per_part, need_mask):
    part = pl.program_id(0)
    step = pl.program_id(1)

    @pl.when(step == 0)
    def _():
        o_ref[...] = jnp.zeros_like(o_ref)

    num_chunks = block_rows // chunk

    def accumulate(masked):
        # Global row index this block was meant to start at (only used when
        # masking; rows >= `rows` come from ragged over-read or clamped
        # duplicate blocks and must contribute nothing).
        row0 = (part * steps_per_part + step) * block_rows

        def body(c, acc):
            r = pl.multiple_of(c * chunk, chunk)
            d = (p_ref[pl.ds(r, chunk), :].astype(jnp.float32)
                 - t_ref[pl.ds(r, chunk), :].astype(jnp.float32))
            sq = d * d
            if masked:
                rid = jax.lax.broadcasted_iota(jnp.int32, (chunk, _LANE), 0)
                sq = jnp.where(rid < (rows - row0 - r), sq, 0.0)
            return acc + jnp.sum(
                sq.reshape(chunk // _SUBLANE, _SUBLANE, _LANE), axis=0)

        acc = jax.lax.fori_loop(
            0, num_chunks, body, jnp.zeros((_SUBLANE, _LANE), jnp.float32))
        # Vector accumulate into the resident (8, 128) output block (VPU has
        # slack in this HBM-bound kernel; no per-step XLU reduce needed).
        o_ref[...] += acc

    if need_mask:
        # Only the block that reaches past `rows` (ragged last block, or the
        # clamped duplicate block of the final partition) takes the masked
        # path; every full block stays on the bare sub+mul+add path.
        block_end = (part * steps_per_part + step + 1) * block_rows
        is_edge = block_end > rows

        @pl.when(jnp.logical_not(is_edge))
        def _():
            accumulate(masked=False)

        @pl.when(is_edge)
        def _():
            accumulate(masked=True)
    else:
        accumulate(masked=False)


def mse_loss(preds, targets):
    """Pallas-TPU MSE loss with mean reduction (matches torch.nn.MSELoss())."""
    assert preds.shape == targets.shape, "MSELoss expects identical shapes"
    n = preds.size
    out_dtype = jnp.result_type(preds.dtype, targets.dtype)

    rows = pl.cdiv(n, _LANE)
    pad = rows * _LANE - n
    p_flat = preds.reshape(-1)
    t_flat = targets.reshape(-1)
    if pad:
        # Only hit when n is not a multiple of 128.  Padding both inputs
        # identically makes the padded diffs exactly 0.
        # TODO(synk): a lane-level in-kernel tail mask would avoid this copy.
        p_flat = jnp.pad(p_flat, (0, pad))
        t_flat = jnp.pad(t_flat, (0, pad))
    p2d = p_flat.reshape(rows, _LANE)
    t2d = t_flat.reshape(rows, _LANE)

    # chunk divides block_rows by construction; both are multiples of 8.
    chunk = min(_CHUNK_ROWS, _round_up(rows, _SUBLANE))
    block_rows = min(_MAX_BLOCK_ROWS, _round_up(rows, chunk))
    num_blocks = pl.cdiv(rows, block_rows)

    # Partition axis: 2 only on multi-TensorCore chips (v7x) so each core
    # streams a disjoint row range; 1 on v5e/v6e (avoids a wasted clamped
    # duplicate-block DMA with zero upside on 1-TC chips).
    num_parts = min(2 if _is_multi_tensorcore_chip() else 1, num_blocks)
    steps_per_part = pl.cdiv(num_blocks, num_parts)
    last_block = num_blocks - 1
    # Mask only when some block over-reads past `rows` (ragged last block or
    # clamped duplicate blocks for the final partition).
    need_mask = (num_parts * steps_per_part * block_rows) != rows

    def in_map(part, step):
        # Clamp so DMAs always stay in bounds; the in-kernel edge mask zeroes
        # any contribution from clamped / ragged blocks.
        return (jnp.minimum(part * steps_per_part + step, last_block), 0)

    kernel = functools.partial(
        _mse_partial_kernel, rows=rows, block_rows=block_rows, chunk=chunk,
        steps_per_part=steps_per_part, need_mask=need_mask)

    in_bytes = 2 * rows * _LANE * jnp.dtype(p2d.dtype).itemsize
    out_bytes = num_parts * _SUBLANE * _LANE * 4

    partials = pl.pallas_call(
        kernel,
        out_shape=jax.ShapeDtypeStruct((num_parts * _SUBLANE, _LANE),
                                       jnp.float32),
        grid_spec=pltpu.PrefetchScalarGridSpec(
            num_scalar_prefetch=0,
            grid=(num_parts, steps_per_part),
            in_specs=[
                pl.BlockSpec((block_rows, _LANE), in_map),
                pl.BlockSpec((block_rows, _LANE), in_map),
            ],
            out_specs=pl.BlockSpec((_SUBLANE, _LANE),
                                   lambda part, step: (part, 0)),
        ),
        compiler_params=pltpu.CompilerParams(
            dimension_semantics=("parallel", "arbitrary"),
            vmem_limit_bytes=_VMEM_LIMIT_BYTES,
        ),
        cost_estimate=pl.CostEstimate(
            flops=3 * n, transcendentals=0,
            bytes_accessed=in_bytes + out_bytes),
    )(p2d, t2d)

    # Tiny trailing collapse (<= 2048 partial lanes) + mean scale.
    loss = jnp.sum(partials) / jnp.float32(n)
    return loss.astype(out_dtype)


def _check(shape, key, rtol=1e-4, atol=1e-6):
    k1, k2 = jax.random.split(key)
    preds = jax.random.normal(k1, shape, dtype=jnp.float32)
    targets = jax.random.normal(k2, shape, dtype=jnp.float32)
    loss = jax.block_until_ready(mse_loss(preds, targets))
    ref = jnp.mean((preds - targets) ** 2)
    assert jnp.allclose(loss, ref, rtol=rtol, atol=atol), (shape, loss, ref)


if __name__ == "__main__":
    key = jax.random.PRNGKey(0)
    k0, k1, k2 = jax.random.split(key, 3)

    # Primary small example consistent with a typical prediction/target pair.
    _check((2, 4, 16, 16), k0)
    # Ragged size (n % 128 != 0): exercises the pad + in-kernel edge-mask path.
    _check((3, 5, 7), k1)
    # Multi-chunk size: exercises the in-kernel streaming fori_loop path.
    _check((2, 256, 1024), k2)

    print("KERNEL_OK")
</pallas_src>

<mosaic_0001>
module attributes {stable_mosaic.version = 11 : i64} {
  func.func @_mse_partial_kernel(%arg0: i32, %arg1: i32, %arg2: memref<16x128xf32, #tpu.memory_space<vmem>>, %arg3: memref<16x128xf32, #tpu.memory_space<vmem>>, %arg4: memref<8x128xf32, #tpu.memory_space<vmem>>) attributes {dimension_semantics = [#tpu.dimension_semantics<parallel>, #tpu.dimension_semantics<arbitrary>], iteration_bounds = array<i64: 1, 1>, scalar_prefetch = 0 : i64, scratch_operands = 0 : i64, tpu.core_type = #tpu.core_type<tc>, window_params = [{transform_indices = @transform_0, window_bounds = array<i64: 16, 128>}, {transform_indices = @transform_1, window_bounds = array<i64: 16, 128>}, {transform_indices = @transform_2, window_bounds = array<i64: 8, 128>}]} {
    %c0_i32 = arith.constant 0 : i32
    %0 = arith.cmpi eq, %arg1, %c0_i32 : i32
    %1 = arith.extui %0 : i1 to i32
    %c0_i32_0 = arith.constant 0 : i32
    %2 = arith.cmpi ne, %1, %c0_i32_0 : i32
    scf.if %2 {
      %cst_8 = arith.constant 0.000000e+00 : f32
      %18 = vector.broadcast %cst_8 : f32 to vector<8x128xf32>
      %c0_9 = arith.constant 0 : index
      %c0_10 = arith.constant 0 : index
      %19 = vector.load %arg4[%c0_9, %c0_10] : memref<8x128xf32, #tpu.memory_space<vmem>>, vector<8x128xf32>
      tpu.vector_store %arg4[%c0_9, %c0_10], %18 {strides = array<i32>} : memref<8x128xf32, #tpu.memory_space<vmem>>, vector<8x128xf32>,
    } else {
    }
    %cst = arith.constant 0.000000e+00 : f32
    %3 = vector.broadcast %cst : f32 to vector<8x128xf32>
    %c0_i32_1 = arith.constant 0 : i32
    %c16_i32 = arith.constant 16 : i32
    %4 = arith.muli %c0_i32_1, %c16_i32 : i32
    %5 = tpu.assume_multiple %4, 16 : i32
    %6 = arith.index_cast %5 : i32 to index
    %c0 = arith.constant 0 : index
    %7 = vector.load %arg2[%6, %c0] : memref<16x128xf32, #tpu.memory_space<vmem>>, vector<16x128xf32>
    %8 = arith.index_cast %5 : i32 to index
    %c0_2 = arith.constant 0 : index
    %9 = vector.load %arg3[%8, %c0_2] : memref<16x128xf32, #tpu.memory_space<vmem>>, vector<16x128xf32>
    %10 = arith.subf %7, %9 : vector<16x128xf32>
    %11 = arith.mulf %10, %10 : vector<16x128xf32>
    %12 = vector.shape_cast %11 : vector<16x128xf32> to vector<2x8x128xf32>
    %cst_3 = arith.constant dense<0.000000e+00> : vector<8x128xf32>
    %13 = vector.multi_reduction <add>, %12, %cst_3 [0] : vector<2x8x128xf32> to vector<8x128xf32>
    %14 = arith.addf %3, %13 : vector<8x128xf32>
    %c1_i32 = arith.constant 1 : i32
    %c0_4 = arith.constant 0 : index
    %c0_5 = arith.constant 0 : index
    %15 = vector.load %arg4[%c0_4, %c0_5] : memref<8x128xf32, #tpu.memory_space<vmem>>, vector<8x128xf32>
    %16 = arith.addf %15, %14 : vector<8x128xf32>
    %c0_6 = arith.constant 0 : index
    %c0_7 = arith.constant 0 : index
    %17 = vector.load %arg4[%c0_6, %c0_7] : memref<8x128xf32, #tpu.memory_space<vmem>>, vector<8x128xf32>
    tpu.vector_store %arg4[%c0_6, %c0_7], %16 {strides = array<i32>} : memref<8x128xf32, #tpu.memory_space<vmem>>, vector<8x128xf32>,
    return
  }
  func.func @transform_0(%arg0: i32, %arg1: i32) -> (i32, i32) {
    %c1_i32 = arith.constant 1 : i32
    %0 = arith.muli %arg0, %c1_i32 : i32
    %1 = arith.addi %0, %arg1 : i32
    %c0_i32 = arith.constant 0 : i32
    %2 = arith.minsi %1, %c0_i32 : i32
    %c0_i32_0 = arith.constant 0 : i32
    %c0_i32_1 = arith.constant 0 : i32
    return %2, %c0_i32_0 : i32, i32
  }
  func.func @transform_1(%arg0: i32, %arg1: i32) -> (i32, i32) {
    %c1_i32 = arith.constant 1 : i32
    %0 = arith.muli %arg0, %c1_i32 : i32
    %1 = arith.addi %0, %arg1 : i32
    %c0_i32 = arith.constant 0 : i32
    %2 = arith.minsi %1, %c0_i32 : i32
    %c0_i32_0 = arith.constant 0 : i32
    %c0_i32_1 = arith.constant 0 : i32
    return %2, %c0_i32_0 : i32, i32
  }
  func.func @transform_2(%arg0: i32, %arg1: i32) -> (i32, i32) {
    %c0_i32 = arith.constant 0 : i32
    %c0_i32_0 = arith.constant 0 : i32
    return %arg0, %c0_i32 : i32, i32
  }
}

</mosaic_0001>

<bundles_post_ra>
// kernel: tpu_custom_call.1
= control target key start
LH: loop header
LB: loop body
LE: loop exit
PB: predicated region body
PF: predicated region fallthrough
CT: control target
= control target key end

     0   :  { %7 = vsyncpa [#allocation3], 0  ;;  %s232_s0 = inlined_call_operand.hbm [shape: f32[16,128], index: 0, kind: input, shape index: {}]   ;;  %s233_s1 = inlined_call_operand.hbm [shape: f32[16,128], index: 1, kind: input, shape index: {}]   ;;  %s234_s2 = inlined_call_operand.hbm [shape: f32[8,128], index: 2, kind: output, shape index: {}]  }
   0x1   :  { %8 = vsyncpa [#allocation6], 0 }
   0x2   :  { %9 = vsyncpa [#allocation4], 0  ;;  %s176_s9 = smov [#allocation2]   ;;  %s104_s13 = scalar_lea.hbm %s232_s0, 256 }
   0x3   :  { %s21_s10 = sshll.u32 %s176_s9, 4  ;;  %p105_p0 = scmp.ne.s32.totalorder %s232_s0, %s104_s13  ;;  %s22_s10 = int_to_ptr.vmem [resolvable:$true] %s21_s10 }
   0x4   :  { %p108_p1 = scmp.lt.u32.totalorder %s104_s13, %s232_s0 }
   0x6   :  { %p110_p2 = pnand %p108_p1, %p105_p0 }
   0x8   :  { %113 = shalt.err (!%p110_p2)
}
   0x9   :  { %s114_s18 = scalar_lea.vmem %s22_s10, 256  ;;  %p119_p4 = scmp.lt.s32.totalorder %s22_s10, %s22_s10 }
   0xa   :  { %p115_p3 = scmp.ne.s32.totalorder %s22_s10, %s114_s18  ;;  %p120_p5 = scmp.lt.s32.totalorder %s114_s18, %s114_s18 }
   0xc   :  { %p121_p6 = por %p120_p5, %p119_p4 }
   0xe   :  { %p122_p7 = pnand %p121_p6, %p115_p3 }
  0x10   :  { %125 = shalt.err (!%p122_p7)
}
  0x11   :  { %s177_s19 = smov 128   ;;  %s178_s20 = smov 8  }
  0x12   :  { %27 = dma.hbm_to_vmem [thread:$0]  %s232_s0, 256, %s22_s10, [#allocation3], %s177_s19, %s177_s19, %s178_s20  }
  0x13   :  { %s179_s23 = smov [#allocation5]   ;;  %s126_s27 = scalar_lea.hbm %s233_s1, 256 }
  0x14   :  { %s39_s24 = sshll.u32 %s179_s23, 4  ;;  %p127_p8 = scmp.ne.s32.totalorder %s233_s1, %s126_s27  ;;  %s40_s24 = int_to_ptr.vmem [resolvable:$true] %s39_s24 }
  0x15   :  { %p130_p9 = scmp.lt.u32.totalorder %s126_s27, %s233_s1 }
  0x17   :  { %p132_p10 = pnand %p130_p9, %p127_p8 }
  0x19   :  { %135 = shalt.err (!%p132_p10)
}
  0x1a   :  { %s136_s4 = scalar_lea.vmem %s40_s24, 256  ;;  %p141_p12 = scmp.lt.s32.totalorder %s40_s24, %s40_s24 }
  0x1b   :  { %p137_p11 = scmp.ne.s32.totalorder %s40_s24, %s136_s4  ;;  %p142_p13 = scmp.lt.s32.totalorder %s136_s4, %s136_s4 }
  0x1d   :  { %p143_p0 = por %p142_p13, %p141_p12 }
  0x1f   :  { %p144_p1 = pnand %p143_p0, %p137_p11 }
  0x21   :  { %147 = shalt.err (!%p144_p1)
}
  0x22   :  { %45 = dma.hbm_to_vmem [thread:$0]  %s233_s1, 256, %s40_s24, [#allocation6], %s177_s19, %s177_s19, %s178_s20  }
  0x23   :  { %170 = dma.done.wait [#allocation3], 256  }
  0x24   :  { %171 = vsyncadd [#allocation3], 4294967040 }
  0x25   :  { %172 = dma.done.wait [#allocation6], 256  }
  0x26   :  { %173 = vsyncadd [#allocation6], 4294967040  ;;  %v65_v0 = vld [vmem:[#allocation2] sm:$0xff]  ;;  %v66_v1 = vld [vmem:[#allocation2 + $0x8] sm:$0xff]  ;;  %s180_s6 = smov [#allocation7]  }
  0x27   :  { %v67_v2 = vld [vmem:[#allocation5] sm:$0xff]  ;;  %v68_v3 = vld [vmem:[#allocation5 + $0x8] sm:$0xff]  ;;  %s84_s7 = sshll.u32 %s180_s6, 4  ;;  %s85_s7 = int_to_ptr.vmem [resolvable:$true] %s84_s7 }
  0x28   :  { %v69_v4 = vsub.f32 %v65_v0, %v67_v2  ;;  %v70_v5 = vsub.f32 %v66_v1, %v68_v3  ;;  %s148_s8 = scalar_lea.vmem %s85_s7, 128  ;;  %p153_p3 = scmp.lt.s32.totalorder %s85_s7, %s85_s7 }
  0x29   :  { %p149_p2 = scmp.ne.s32.totalorder %s85_s7, %s148_s8  ;;  %p154_p4 = scmp.lt.s32.totalorder %s148_s8, %s148_s8 }
  0x2a   :  { %v71_v6 = vmul.f32 %v69_v4, %v69_v4  ;;  %v72_v7 = vmul.f32 %v70_v5, %v70_v5 }
  0x2b   :  { %p155_p5 = por %p154_p4, %p153_p3 }
  0x2c   :  { %v73_v8 = vadd.f32 %v72_v7, %v71_v6 }
  0x2d   :  { %p156_p6 = pnand %p155_p5, %p149_p2 }
  0x2e   :  { %77 = vst [vmem:[#allocation7] sm:$0xff] %v73_v8 }
  0x2f   :  { %159 = shalt.err (!%p156_p6)
}
  0x30   :  { %s160_s10 = scalar_lea.hbm %s234_s2, 128 }
  0x31   :  { %p161_p7 = scmp.ne.s32.totalorder %s234_s2, %s160_s10  ;;  %p164_p8 = scmp.lt.u32.totalorder %s160_s10, %s234_s2 }
  0x33   :  { %p166_p9 = pnand %p164_p8, %p161_p7 }
  0x35   :  { %169 = shalt.err (!%p166_p9)
}
  0x36   :  { %87 = dma.vmem_to_hbm [thread:$0]  %s85_s7, 128, %s234_s2, [#allocation4]  }
  0x37   :  { %174 = dma.done.wait [#allocation4], 128  }
  0x38   :  { %175 = vsyncadd [#allocation4], 4294967168 }
  0x39   :  { %91 = vsyncpa [#allocation3], 1 }
  0x3a   :  { %92 = vsyncpa [#allocation6], 1 }
  0x3b   :  { %93 = vsyncpa [#allocation4], 1 }

</bundles_post_ra>
